<compile_context>
chip_gen: v6e
topology: v6e:2x2x1
jax: 0.10.0
libtpu: 0.0.40
codegen_flags: <defaults>
</compile_context>

<pallas_src>
import functools

import jax
import jax.numpy as jnp
from jax.experimental import pallas as pl
from jax.experimental.pallas import tpu as pltpu

LANES = 128
TARGET_BLOCK_BYTES = 4 * 1024 * 1024   # ~4 MiB of input per block per operand
VMEM_LIMIT_BYTES = 40 * 1024 * 1024    # 2 inputs x 2 bufs x 4 MiB = 16 MiB + headroom


def _abs_sum_kernel(x_ref, y_ref, o_ref, *, rows, block_rows, acc_rows, nb,
                    need_mask):
    j = pl.program_id(0)   # streaming reduction axis ("arbitrary")

    @pl.when(j == 0)
    def _():
        o_ref[...] = jnp.zeros_like(o_ref)

    # In-kernel upcast: cheap VPU work, halves HBM traffic for bf16/fp16.
    x = x_ref[...].astype(jnp.float32)
    y = y_ref[...].astype(jnp.float32)
    absdiff = jnp.abs(x - y)

    def accumulate(vals):
        if block_rows == acc_rows:
            o_ref[...] += vals
        else:
            # Sum over the leading axis is pure elementwise vreg adds (no XLU)
            # into acc_rows//8 independent f32 vregs per lane column.
            o_ref[...] += vals.reshape(
                block_rows // acc_rows, acc_rows, LANES).sum(axis=0)

    if need_mask:
        # Only the partial last block pays the mask cost.
        @pl.when(j != nb - 1)
        def _():
            accumulate(absdiff)

        @pl.when(j == nb - 1)
        def _():
            row_ids = j * block_rows + jax.lax.broadcasted_iota(
                jnp.int32, (block_rows, LANES), 0)
            accumulate(jnp.where(row_ids < rows, absdiff, 0.0))
    else:
        accumulate(absdiff)


def l2loss(inputs, targets):
    """Pallas implementation of L2loss.forward: mean(|inputs - targets|)."""
    assert inputs.shape == targets.shape
    n = inputs.size

    xf = inputs.reshape(-1)
    yf = targets.reshape(-1)

    rows = n // LANES
    rem = n - rows * LANES

    # Unaligned (<128 element) tail: tiny jnp reduction, no full-array pad.
    tail = jnp.float32(0.0)
    if rem:
        # TODO(synk): the aligned-prefix slice below still materializes a copy
        # for unaligned sizes; a fully copy-free path would need a manual 1-D
        # HBM DMA with lane masking.
        tail = jnp.sum(jnp.abs(xf[rows * LANES:].astype(jnp.float32)
                               - yf[rows * LANES:].astype(jnp.float32)))
        xf = xf[: rows * LANES]
        yf = yf[: rows * LANES]

    if rows == 0:
        # Entire input fits in the tail path (n < 128).
        return (tail / n).astype(inputs.dtype)

    assert rows < 2 ** 31, "int32 row ids in the kernel would overflow"

    x2 = xf.reshape(rows, LANES)
    y2 = yf.reshape(rows, LANES)

    # Accumulator width: 32 rows (4 independent f32 vreg chains) when possible.
    if rows >= 32:
        acc_rows = 32
    elif rows >= 8:
        acc_rows = 8
    else:
        acc_rows = rows   # tiny input: single full-extent block

    itemsize = jnp.dtype(inputs.dtype).itemsize
    target_rows = max(
        acc_rows,
        (TARGET_BLOCK_BYTES // (LANES * itemsize)) // acc_rows * acc_rows)
    if rows >= acc_rows:
        block_rows = min(target_rows, (rows // acc_rows) * acc_rows)
    else:
        block_rows = rows
    nb = (rows + block_rows - 1) // block_rows
    need_mask = (rows % block_rows) != 0   # only the last block is partial

    kernel = functools.partial(
        _abs_sum_kernel,
        rows=rows,
        block_rows=block_rows,
        acc_rows=acc_rows,
        nb=nb,
        need_mask=need_mask,
    )

    partials = pl.pallas_call(
        kernel,
        out_shape=jax.ShapeDtypeStruct((acc_rows, LANES), jnp.float32),
        grid_spec=pltpu.PrefetchScalarGridSpec(
            num_scalar_prefetch=0,
            grid=(nb,),
            in_specs=[
                pl.BlockSpec((block_rows, LANES), lambda j: (j, 0)),
                pl.BlockSpec((block_rows, LANES), lambda j: (j, 0)),
            ],
            # Lane-dense accumulator block, resident across the reduction axis.
            out_specs=pl.BlockSpec((acc_rows, LANES), lambda j: (0, 0)),
        ),
        compiler_params=pltpu.CompilerParams(
            dimension_semantics=("arbitrary",),
            vmem_limit_bytes=VMEM_LIMIT_BYTES,
        ),
    )(x2, y2)

    # Single final cross-lane reduce on a tiny (acc_rows, 128) array.
    total = jnp.sum(partials) + tail
    return (total / n).astype(inputs.dtype)


if __name__ == "__main__":
    key = jax.random.PRNGKey(0)
    k1, k2 = jax.random.split(key)
    # NCHW-shaped example inputs (module is elementwise, layout-agnostic).
    x = jax.random.normal(k1, (2, 4, 16, 16), dtype=jnp.float32)
    t = jax.random.normal(k2, (2, 4, 16, 16), dtype=jnp.float32)

    loss = l2loss(x, t)
    jax.block_until_ready(loss)

    ref = jnp.mean(jnp.abs(x - t))
    assert jnp.allclose(loss, ref, atol=1e-6, rtol=1e-5), (loss, ref)
    print("KERNEL_OK")
</pallas_src>

<mosaic_0001>
module attributes {stable_mosaic.version = 11 : i64} {
  func.func @_abs_sum_kernel(%arg0: i32, %arg1: memref<16x128xf32, #tpu.memory_space<vmem>>, %arg2: memref<16x128xf32, #tpu.memory_space<vmem>>, %arg3: memref<8x128xf32, #tpu.memory_space<vmem>>) attributes {dimension_semantics = [#tpu.dimension_semantics<arbitrary>], iteration_bounds = array<i64: 1>, scalar_prefetch = 0 : i64, scratch_operands = 0 : i64, tpu.core_type = #tpu.core_type<tc>, window_params = [{transform_indices = @transform_0, window_bounds = array<i64: 16, 128>}, {transform_indices = @transform_1, window_bounds = array<i64: 16, 128>}, {pipeline_mode = #tpu.pipeline_mode<synchronous>, transform_indices = @transform_2, window_bounds = array<i64: 8, 128>}]} {
    %c0_i32 = arith.constant 0 : i32
    %0 = arith.cmpi eq, %arg0, %c0_i32 : i32
    %1 = arith.extui %0 : i1 to i32
    %c0_i32_0 = arith.constant 0 : i32
    %2 = arith.cmpi ne, %1, %c0_i32_0 : i32
    scf.if %2 {
      %cst_8 = arith.constant 0.000000e+00 : f32
      %12 = vector.broadcast %cst_8 : f32 to vector<8x128xf32>
      %c0_9 = arith.constant 0 : index
      %c0_10 = arith.constant 0 : index
      %13 = vector.load %arg3[%c0_9, %c0_10] : memref<8x128xf32, #tpu.memory_space<vmem>>, vector<8x128xf32>
      tpu.vector_store %arg3[%c0_9, %c0_10], %12 {strides = array<i32>} : memref<8x128xf32, #tpu.memory_space<vmem>>, vector<8x128xf32>,
    } else {
    }
    %c0 = arith.constant 0 : index
    %c0_1 = arith.constant 0 : index
    %3 = vector.load %arg1[%c0, %c0_1] : memref<16x128xf32, #tpu.memory_space<vmem>>, vector<16x128xf32>
    %c0_2 = arith.constant 0 : index
    %c0_3 = arith.constant 0 : index
    %4 = vector.load %arg2[%c0_2, %c0_3] : memref<16x128xf32, #tpu.memory_space<vmem>>, vector<16x128xf32>
    %5 = arith.subf %3, %4 : vector<16x128xf32>
    %6 = math.absf %5 : vector<16x128xf32>
    %c0_4 = arith.constant 0 : index
    %c0_5 = arith.constant 0 : index
    %7 = vector.load %arg3[%c0_4, %c0_5] : memref<8x128xf32, #tpu.memory_space<vmem>>, vector<8x128xf32>
    %8 = vector.shape_cast %6 : vector<16x128xf32> to vector<2x8x128xf32>
    %cst = arith.constant dense<0.000000e+00> : vector<8x128xf32>
    %9 = vector.multi_reduction <add>, %8, %cst [0] : vector<2x8x128xf32> to vector<8x128xf32>
    %10 = arith.addf %7, %9 : vector<8x128xf32>
    %c0_6 = arith.constant 0 : index
    %c0_7 = arith.constant 0 : index
    %11 = vector.load %arg3[%c0_6, %c0_7] : memref<8x128xf32, #tpu.memory_space<vmem>>, vector<8x128xf32>
    tpu.vector_store %arg3[%c0_6, %c0_7], %10 {strides = array<i32>} : memref<8x128xf32, #tpu.memory_space<vmem>>, vector<8x128xf32>,
    return
  }
  func.func @transform_0(%arg0: i32) -> (i32, i32) {
    %c0_i32 = arith.constant 0 : i32
    %c0_i32_0 = arith.constant 0 : i32
    return %arg0, %c0_i32 : i32, i32
  }
  func.func @transform_1(%arg0: i32) -> (i32, i32) {
    %c0_i32 = arith.constant 0 : i32
    %c0_i32_0 = arith.constant 0 : i32
    return %arg0, %c0_i32 : i32, i32
  }
  func.func @transform_2(%arg0: i32) -> (i32, i32) {
    %c0_i32 = arith.constant 0 : i32
    %c0_i32_0 = arith.constant 0 : i32
    %c0_i32_1 = arith.constant 0 : i32
    return %c0_i32, %c0_i32_0 : i32, i32
  }
}

</mosaic_0001>

<bundles_post_ra>
// kernel: tpu_custom_call.1
= control target key start
LH: loop header
LB: loop body
LE: loop exit
PB: predicated region body
PF: predicated region fallthrough
CT: control target
= control target key end

     0   :  { %7 = vsyncpa [#allocation3], 0  ;;  %s174_s0 = inlined_call_operand.hbm [shape: f32[16,128], index: 0, kind: input, shape index: {}]   ;;  %s175_s1 = inlined_call_operand.hbm [shape: f32[16,128], index: 1, kind: input, shape index: {}]   ;;  %s176_s2 = inlined_call_operand.hbm [shape: f32[8,128], index: 2, kind: output, shape index: {}]  }
   0x1   :  { %8 = vsyncpa [#allocation6], 0 }
   0x2   :  { %9 = vsyncpa [#allocation4], 0  ;;  %s145_s9 = smov [#allocation2]  }
   0x3   :  { %s15_s10 = sshll.u32 %s145_s9, 4  ;;  %s16_s10 = int_to_ptr.vmem [resolvable:$true] %s15_s10 }
   0x4   :  { %s87_s11 = scalar_lea.vmem %s16_s10, 256  ;;  %p92_p1 = scmp.lt.s32.totalorder %s16_s10, %s16_s10 }
   0x5   :  { %p88_p0 = scmp.ne.s32.totalorder %s16_s10, %s87_s11  ;;  %p93_p2 = scmp.lt.s32.totalorder %s87_s11, %s87_s11 }
   0x7   :  { %p94_p3 = por %p93_p2, %p92_p1 }
   0x9   :  { %p95_p4 = pnand %p94_p3, %p88_p0 }
   0xb   :  { %98 = shalt.err (!%p95_p4)
}
   0xc   :  { %s146_s12 = smov 128   ;;  %s147_s13 = smov 8  }
   0xd   :  { %21 = dma.hbm_to_vmem [thread:$0]  %s174_s0, 256, %s16_s10, [#allocation3], %s146_s12, %s146_s12, %s147_s13  }
   0xe   :  { %s148_s16 = smov [#allocation5]  }
   0xf   :  { %s27_s17 = sshll.u32 %s148_s16, 4  ;;  %s28_s17 = int_to_ptr.vmem [resolvable:$true] %s27_s17 }
  0x10   :  { %s107_s18 = scalar_lea.vmem %s28_s17, 256  ;;  %p112_p6 = scmp.lt.s32.totalorder %s28_s17, %s28_s17 }
  0x11   :  { %p108_p5 = scmp.ne.s32.totalorder %s28_s17, %s107_s18  ;;  %p113_p7 = scmp.lt.s32.totalorder %s107_s18, %s107_s18 }
  0x13   :  { %p114_p8 = por %p113_p7, %p112_p6 }
  0x15   :  { %p115_p9 = pnand %p114_p8, %p108_p5 }
  0x17   :  { %118 = shalt.err (!%p115_p9)
}
  0x18   :  { %33 = dma.hbm_to_vmem [thread:$0]  %s175_s1, 256, %s28_s17, [#allocation6], %s146_s12, %s146_s12, %s147_s13  }
  0x19   :  { %139 = dma.done.wait [#allocation3], 256  }
  0x1a   :  { %140 = vsyncadd [#allocation3], 4294967040 }
  0x1b   :  { %141 = dma.done.wait [#allocation6], 256  }
  0x1c   :  { %142 = vsyncadd [#allocation6], 4294967040  ;;  %v45_v0 = vld [vmem:[#allocation2] sm:$0xff]  ;;  %v46_v1 = vld [vmem:[#allocation2 + $0x8] sm:$0xff]  ;;  %s149_s0 = smov [#allocation7]  }
  0x1d   :  { %v47_v2 = vld [vmem:[#allocation5] sm:$0xff]  ;;  %v48_v3 = vld [vmem:[#allocation5 + $0x8] sm:$0xff]  ;;  %s63_s21 = sshll.u32 %s149_s0, 4  ;;  %s64_s21 = int_to_ptr.vmem [resolvable:$true] %s63_s21 }
  0x1e   :  { %v49_v4 = vsub.f32 %v45_v0, %v47_v2  ;;  %v50_v5 = vsub.f32 %v46_v1, %v48_v3  ;;  %s119_s22 = scalar_lea.vmem %s64_s21, 128  ;;  %p124_p11 = scmp.lt.s32.totalorder %s64_s21, %s64_s21 }
  0x1f   :  { %p120_p10 = scmp.ne.s32.totalorder %s64_s21, %s119_s22  ;;  %p125_p12 = scmp.lt.s32.totalorder %s119_s22, %s119_s22 }
  0x20   :  { %v51_v6 = vand.u32 2147483647, %v49_v4  ;;  %v52_v7 = vand.u32 2147483647, %v50_v5 }
  0x21   :  { %p126_p13 = por %p125_p12, %p124_p11 }
  0x22   :  { %v54_v8 = vadd.f32 %v52_v7, %v51_v6 }
  0x23   :  { %p127_p0 = pnand %p126_p13, %p120_p10 }
  0x24   :  { %56 = vst [vmem:[#allocation7] sm:$0xff] %v54_v8 }
  0x25   :  { %130 = shalt.err (!%p127_p0)
}
  0x26   :  { %66 = dma.vmem_to_hbm [thread:$0]  %s64_s21, 128, %s176_s2, [#allocation4]  }
  0x27   :  { %143 = dma.done.wait [#allocation4], 128  }
  0x28   :  { %144 = vsyncadd [#allocation4], 4294967168 }
  0x29   :  { %70 = vsyncpa [#allocation3], 1 }
  0x2a   :  { %71 = vsyncpa [#allocation6], 1 }
  0x2b   :  { %72 = vsyncpa [#allocation4], 1 }

</bundles_post_ra>
